<compile_context>
chip_gen: v7x
topology: tpu7x:2x2x1
jax: 0.10.0
libtpu: 0.0.40
codegen_flags: <defaults>
</compile_context>

<pallas_src>
import functools
import math

import jax
import jax.numpy as jnp
from jax.experimental import pallas as pl
from jax.experimental.pallas import tpu as pltpu

MARGIN = 1.0   # F.triplet_margin_loss default
EPS = 1e-6     # F.triplet_margin_loss / pairwise_distance default


def _triplet_hinge_kernel(x_ref, o_ref, *, time_axis, inv_t):
    """Per-row triplet hinge for one tile of triplets.

    x_ref: (3, tm, T, C) or (3, tm, C, T) block in the input's native dtype
           (anchor / positive / negative thirds stacked on the leading axis).
    o_ref: (1, tm) float32 per-row hinge values (lane-dense).
    """
    # Rate.rate: mean over time.  The f32 cast is folded into the reduction so
    # no full-tile f32 temporaries are materialized; the scale is a single VPU
    # multiply by 1/T on the already-reduced (tm, C) rates.
    ra = jnp.sum(x_ref[0], axis=time_axis, dtype=jnp.float32) * inv_t   # (tm, C)
    rp = jnp.sum(x_ref[1], axis=time_axis, dtype=jnp.float32) * inv_t   # (tm, C)
    rn = jnp.sum(x_ref[2], axis=time_axis, dtype=jnp.float32) * inv_t   # (tm, C)

    # torch.pairwise_distance(p=2, eps=1e-6): ||x1 - x2 + eps||_2 over features.
    dap = ra - rp + EPS
    dan = ra - rn + EPS
    d_ap = jnp.sqrt(jnp.sum(dap * dap, axis=-1))     # (tm,)
    d_an = jnp.sqrt(jnp.sum(dan * dan, axis=-1))     # (tm,)

    # Triplet margin hinge (swap=False, margin=1.0); reduction happens outside.
    o_ref[...] = jnp.maximum(d_ap - d_an + MARGIN, 0.0)[None, :]   # (1, tm)


def _tuning():
    """Per-generation (tile target per triplet-third, vmem_limit_bytes)."""
    try:
        vmem_cap = int(pltpu.get_tpu_info().vmem_capacity_bytes)
    except Exception:
        vmem_cap = 64 << 20                    # conservative fallback (v7x-like)
    if vmem_cap <= (64 << 20):
        # v7x: 64 MiB VMEM per TC, very high HBM BW -> moderate tiles,
        # keep total pipeline VMEM well under the per-TC capacity.
        return 3 << 20, 48 << 20
    # v5e / v6e: 128 MiB VMEM -> bigger tiles amortize per-step overhead.
    return 6 << 20, 64 << 20


def _pick_block_m(m, t, c, itemsize, per_third_target_bytes):
    """Triplet rows per tile, sized to ~per_third_target_bytes per input third."""
    bytes_per_row = max(1, t * c * itemsize)
    rows = max(1, per_third_target_bytes // bytes_per_row)
    if m >= 256:
        # Keep the parallel grid >= 2 steps so v7x megacore can use both TCs.
        rows = min(rows, -(-m // 2))
    if rows >= m:
        return m
    if rows >= 128:
        return (rows // 128) * 128     # lane-dense, unmasked output stores
    return max(8, (rows // 8) * 8)


def triplet_loss_with_mining(x, label=None, *, reduction="mean", block_m=None):
    """Forward of TripletLossWithMining (moving_window=None path).

    x: (B, ..., T) spike tensor, B % 3 == 0.  Stays in its native dtype.
    `label` is unused on the window=None path (matches the PyTorch module).
    """
    del label  # unused when moving_window is None
    # TODO(synk): moving_window (slayer.classifier.MovingWindow) branch not implemented.
    b = x.shape[0]
    t = x.shape[-1]
    if b % 3 != 0:
        raise ValueError(f"batch {b} must be divisible by 3 (anchor/positive/negative)")
    m = b // 3
    c = math.prod(x.shape[1:-1]) if x.ndim > 2 else 1

    if t >= 128:
        # Time axis is already lane-dense: keep the native layout (free reshape,
        # no extra HBM pass) and reduce time along lanes in-kernel.
        x4 = x.reshape(3, m, c, t)                            # (3, m, C, T)
        feat_dims = (c, t)
        time_axis = -1
    else:
        # Small T: a T-minor layout would waste most of the 128 lanes, so put
        # the wide feature axis on lanes instead.
        # TODO(synk): have the producing layer emit (..., T, C) directly so this
        # one-off transpose pass over HBM disappears.
        x4 = jnp.swapaxes(x.reshape(3, m, c, t), -1, -2)      # (3, m, T, C)
        feat_dims = (t, c)
        time_axis = -2

    itemsize = x4.dtype.itemsize
    per_third_target, vmem_limit = _tuning()
    tm = block_m if block_m is not None else _pick_block_m(m, t, c, itemsize,
                                                           per_third_target)
    num_tiles = pl.cdiv(m, tm)

    cost = pl.CostEstimate(
        flops=int(3 * m * c * t + 10 * m * c),
        transcendentals=int(2 * m),
        bytes_accessed=int(3 * m * t * c * itemsize + 4 * num_tiles * tm),
    )

    kernel = functools.partial(_triplet_hinge_kernel,
                               time_axis=time_axis, inv_t=1.0 / t)

    hinge = pl.pallas_call(
        kernel,
        out_shape=jax.ShapeDtypeStruct((num_tiles, tm), jnp.float32),
        grid_spec=pltpu.PrefetchScalarGridSpec(
            num_scalar_prefetch=0,
            grid=(num_tiles,),
            in_specs=[
                # One block covers the anchor/positive/negative thirds of the
                # same row range -> one DMA + one semaphore wait per step.
                pl.BlockSpec((3, tm) + feat_dims, lambda i: (0, i, 0, 0)),
            ],
            out_specs=pl.BlockSpec((1, tm), lambda i: (i, 0)),   # lane-dense rows
        ),
        compiler_params=pltpu.CompilerParams(
            dimension_semantics=("parallel",),   # independent row tiles (v7x: 2 TCs)
            vmem_limit_bytes=vmem_limit,
        ),
        cost_estimate=cost,
    )(x4)

    hinge = hinge.reshape(-1)[:m]    # drop padded tail rows of the last tile
    if reduction == "mean":
        return jnp.mean(hinge)       # tiny (m scalars) — done in XLA
    if reduction == "sum":
        return jnp.sum(hinge)
    return hinge                     # 'none'


def _reference(x):
    """Pure-JAX reference mirroring the PyTorch module."""
    b = x.shape[0]
    t = x.shape[-1]
    x3 = x.reshape(b, -1, t).astype(jnp.float32)
    rate = jnp.mean(x3, axis=-1)
    m = b // 3
    a, p, n = rate[:m], rate[m:2 * m], rate[2 * m:3 * m]
    d_ap = jnp.sqrt(jnp.sum((a - p + EPS) ** 2, axis=-1))
    d_an = jnp.sqrt(jnp.sum((a - n + EPS) ** 2, axis=-1))
    return jnp.mean(jnp.maximum(d_ap - d_an + MARGIN, 0.0))


if __name__ == "__main__":
    key = jax.random.PRNGKey(0)
    k1, k2, k3 = jax.random.split(key, 3)

    # Small-T case: batch=6 (2 triplets), channels=4, spatial=16, time=8.
    x_small_t = jax.random.bernoulli(k1, p=0.3, shape=(6, 4, 16, 8)).astype(jnp.float32)
    label = jax.random.randint(k2, (6,), 0, 10)   # unused (window is None)

    loss1 = jax.block_until_ready(triplet_loss_with_mining(x_small_t, label))
    ref1 = _reference(x_small_t)
    assert jnp.allclose(loss1, ref1, rtol=1e-5, atol=1e-6), (loss1, ref1)

    # Long-T case (T >= 128): exercises the zero-transpose native-layout path.
    x_long_t = jax.random.bernoulli(k3, p=0.3, shape=(6, 8, 128)).astype(jnp.float32)
    loss2 = jax.block_until_ready(triplet_loss_with_mining(x_long_t, label))
    ref2 = _reference(x_long_t)
    assert jnp.allclose(loss2, ref2, rtol=1e-5, atol=1e-6), (loss2, ref2)

    print("KERNEL_OK")
</pallas_src>

<mosaic_0001>
module attributes {stable_mosaic.version = 11 : i64} {
  func.func @_triplet_hinge_kernel(%arg0: i32, %arg1: memref<3x2x8x64xf32, #tpu.memory_space<vmem>>, %arg2: memref<1x2xf32, #tpu.memory_space<vmem>>) attributes {dimension_semantics = [#tpu.dimension_semantics<parallel>], iteration_bounds = array<i64: 1>, scalar_prefetch = 0 : i64, scratch_operands = 0 : i64, tpu.core_type = #tpu.core_type<tc>, window_params = [{transform_indices = @transform_0, window_bounds = array<i64: 3, 2, 8, 64>}, {transform_indices = @transform_1, window_bounds = array<i64: 1, 2>}]} {
    %c0 = arith.constant 0 : index
    %c0_0 = arith.constant 0 : index
    %c0_1 = arith.constant 0 : index
    %c0_2 = arith.constant 0 : index
    %0 = vector.load %arg1[%c0, %c0_0, %c0_1, %c0_2] : memref<3x2x8x64xf32, #tpu.memory_space<vmem>>, vector<1x2x8x64xf32>
    %1 = vector.shape_cast %0 : vector<1x2x8x64xf32> to vector<2x8x64xf32>
    %cst = arith.constant dense<0.000000e+00> : vector<2x64xf32>
    %2 = vector.multi_reduction <add>, %1, %cst [1] : vector<2x8x64xf32> to vector<2x64xf32>
    %cst_3 = arith.constant 1.250000e-01 : f32
    %3 = vector.broadcast %cst_3 : f32 to vector<2x64xf32>
    %4 = arith.mulf %2, %3 : vector<2x64xf32>
    %c1 = arith.constant 1 : index
    %c0_4 = arith.constant 0 : index
    %c0_5 = arith.constant 0 : index
    %c0_6 = arith.constant 0 : index
    %5 = vector.load %arg1[%c1, %c0_4, %c0_5, %c0_6] : memref<3x2x8x64xf32, #tpu.memory_space<vmem>>, vector<1x2x8x64xf32>
    %6 = vector.shape_cast %5 : vector<1x2x8x64xf32> to vector<2x8x64xf32>
    %cst_7 = arith.constant dense<0.000000e+00> : vector<2x64xf32>
    %7 = vector.multi_reduction <add>, %6, %cst_7 [1] : vector<2x8x64xf32> to vector<2x64xf32>
    %cst_8 = arith.constant 1.250000e-01 : f32
    %8 = vector.broadcast %cst_8 : f32 to vector<2x64xf32>
    %9 = arith.mulf %7, %8 : vector<2x64xf32>
    %c2 = arith.constant 2 : index
    %c0_9 = arith.constant 0 : index
    %c0_10 = arith.constant 0 : index
    %c0_11 = arith.constant 0 : index
    %10 = vector.load %arg1[%c2, %c0_9, %c0_10, %c0_11] : memref<3x2x8x64xf32, #tpu.memory_space<vmem>>, vector<1x2x8x64xf32>
    %11 = vector.shape_cast %10 : vector<1x2x8x64xf32> to vector<2x8x64xf32>
    %cst_12 = arith.constant dense<0.000000e+00> : vector<2x64xf32>
    %12 = vector.multi_reduction <add>, %11, %cst_12 [1] : vector<2x8x64xf32> to vector<2x64xf32>
    %cst_13 = arith.constant 1.250000e-01 : f32
    %13 = vector.broadcast %cst_13 : f32 to vector<2x64xf32>
    %14 = arith.mulf %12, %13 : vector<2x64xf32>
    %15 = arith.subf %4, %9 : vector<2x64xf32>
    %cst_14 = arith.constant 9.99999997E-7 : f32
    %16 = vector.broadcast %cst_14 : f32 to vector<2x64xf32>
    %17 = arith.addf %15, %16 : vector<2x64xf32>
    %18 = arith.subf %4, %14 : vector<2x64xf32>
    %cst_15 = arith.constant 9.99999997E-7 : f32
    %19 = vector.broadcast %cst_15 : f32 to vector<2x64xf32>
    %20 = arith.addf %18, %19 : vector<2x64xf32>
    %21 = arith.mulf %17, %17 : vector<2x64xf32>
    %cst_16 = arith.constant dense<0.000000e+00> : vector<2xf32>
    %22 = vector.multi_reduction <add>, %21, %cst_16 [1] : vector<2x64xf32> to vector<2xf32>
    %23 = math.sqrt %22 : vector<2xf32>
    %24 = arith.mulf %20, %20 : vector<2x64xf32>
    %cst_17 = arith.constant dense<0.000000e+00> : vector<2xf32>
    %25 = vector.multi_reduction <add>, %24, %cst_17 [1] : vector<2x64xf32> to vector<2xf32>
    %26 = math.sqrt %25 : vector<2xf32>
    %27 = arith.subf %23, %26 : vector<2xf32>
    %cst_18 = arith.constant 1.000000e+00 : f32
    %28 = vector.broadcast %cst_18 : f32 to vector<2xf32>
    %29 = arith.addf %27, %28 : vector<2xf32>
    %cst_19 = arith.constant 0.000000e+00 : f32
    %30 = vector.broadcast %cst_19 : f32 to vector<2xf32>
    %31 = arith.maximumf %29, %30 : vector<2xf32>
    %32 = vector.shape_cast %31 : vector<2xf32> to vector<1x2xf32>
    %c0_20 = arith.constant 0 : index
    %c0_21 = arith.constant 0 : index
    %33 = vector.load %arg2[%c0_20, %c0_21] : memref<1x2xf32, #tpu.memory_space<vmem>>, vector<1x2xf32>
    tpu.vector_store %arg2[%c0_20, %c0_21], %32 {strides = array<i32>} : memref<1x2xf32, #tpu.memory_space<vmem>>, vector<1x2xf32>,
    return
  }
  func.func @transform_0(%arg0: i32) -> (i32, i32, i32, i32) {
    %c0_i32 = arith.constant 0 : i32
    %c0_i32_0 = arith.constant 0 : i32
    %c0_i32_1 = arith.constant 0 : i32
    %c0_i32_2 = arith.constant 0 : i32
    return %c0_i32, %arg0, %c0_i32_0, %c0_i32_1 : i32, i32, i32, i32
  }
  func.func @transform_1(%arg0: i32) -> (i32, i32) {
    %c0_i32 = arith.constant 0 : i32
    %c0_i32_0 = arith.constant 0 : i32
    return %arg0, %c0_i32 : i32, i32
  }
}

</mosaic_0001>

<bundles_post_ra>
// kernel: tpu_custom_call.1
= control target key start
LH: loop header
LB: loop body
LE: loop exit
PB: predicated region body
PF: predicated region fallthrough
CT: control target
= control target key end

     0   :  { %6 = vsyncpa [#allocation3], 0  ;;  %s250_s0 = inlined_call_operand.hbm [shape: f32[3,2,8,64], index: 0, kind: input, shape index: {}]   ;;  %s251_s1 = inlined_call_operand.hbm [shape: f32[1,2], index: 1, kind: output, shape index: {}]  }
   0x1   :  { %7 = vsyncpa [#allocation4], 0  ;;  %s206_s6 = smov [#allocation2]   ;;  %s158_s10 = scalar_lea.hbm %s250_s0, 768 }
   0x2   :  { %s13_s7 = sshll.u32 %s206_s6, 4  ;;  %p159_p0 = scmp.ne.s32.totalorder %s250_s0, %s158_s10  ;;  %s14_s7 = int_to_ptr.vmem [resolvable:$true] %s13_s7 }
   0x3   :  { %p162_p1 = scmp.lt.u32.totalorder %s158_s10, %s250_s0 }
   0x5   :  { %p164_p2 = pnand %p162_p1, %p159_p0 }
   0x7   :  { %167 = shalt.err (!%p164_p2)
}
   0x8   :  { %s168_s15 = scalar_lea.vmem %s14_s7, 768  ;;  %p173_p4 = scmp.lt.s32.totalorder %s14_s7, %s14_s7 }
   0x9   :  { %p169_p3 = scmp.ne.s32.totalorder %s14_s7, %s168_s15  ;;  %p174_p5 = scmp.lt.s32.totalorder %s168_s15, %s168_s15 }
   0xb   :  { %p175_p6 = por %p174_p5, %p173_p4 }
   0xd   :  { %p176_p7 = pnand %p175_p6, %p169_p3 }
   0xf   :  { %179 = shalt.err (!%p176_p7)
}
  0x10   :  { %s207_s16 = smov 128   ;;  %s208_s17 = smov 8  }
  0x11   :  { %19 = dma.hbm_to_vmem [thread:$0]  %s250_s0, 768, %s14_s7, [#allocation3], %s207_s16, %s207_s16, %s208_s17  }
  0x12   :  { %202 = dma.done.wait [#allocation3], 768  }
  0x13   :  { %203 = vsyncadd [#allocation3], 4294966528  ;;  %vm25_vm0 = vcmask 523264   ;;  %v23_v0 = vld [vmem:[#allocation2] sm:$0xff]  ;;  %v24_v1 = vld [vmem:[#allocation2 + $0x8] sm:$0xff]  ;;  %vm92_vm1 = vcmask 1041409  }
  0x14   :  { %v43_v2 = vld [vmem:[#allocation2 + $0x10] sm:$0xff]  ;;  %v26_v3 = vsel %vm25_vm0, %v23_v0, 0.0  ;;  %v33_v4 = vsel %vm25_vm0, %v24_v1, 0.0  ;;  %v44_v5 = vld [vmem:[#allocation2 + $0x18] sm:$0xff]  ;;  %v62_v7 = vld [vmem:[#allocation2 + $0x20] sm:$0xff]  ;;  %vm95_vm2 = vcmask 517120  }
  0x15   :  { %v45_v6 = vsel %vm25_vm0, %v43_v2, 0.0  ;;  %v63_v8 = vld [vmem:[#allocation2 + $0x28] sm:$0xff]  ;;  %v27_v9 = vrot.slane %v26_v3, 4  ;;  %v34_v10 = vrot.slane %v33_v4, 4  ;;  %v52_v12 = vsel %vm25_vm0, %v44_v5, 0.0  ;;  %s209_s0 = smov [#allocation5]  }
  0x16   :  { %v46_v11 = vrot.slane %v45_v6, 4  ;;  %v53_v13 = vrot.slane %v52_v12, 4  ;;  %v64_v14 = vsel %vm25_vm0, %v62_v7, 0.0  ;;  %v71_v15 = vsel %vm25_vm0, %v63_v8, 0.0  ;;  %s141_s20 = sshll.u32 %s209_s0, 4  ;;  %s142_s20 = int_to_ptr.vmem [resolvable:$true] %s141_s20 }
  0x17   :  { %v28_v16 = vadd.f32 %v27_v9, %v26_v3  ;;  %v35_v17 = vadd.f32 %v34_v10, %v33_v4  ;;  %v65_v19 = vrot.slane %v64_v14, 4  ;;  %v72_v21 = vrot.slane %v71_v15, 4  ;;  %s180_s21 = scalar_lea.vmem %s142_s20, 16  ;;  %s184_s22 = scalar_lea.vmem %s142_s20, 32 }
  0x18   :  { %v47_v18 = vadd.f32 %v46_v11, %v45_v6  ;;  %v54_v20 = vadd.f32 %v53_v13, %v52_v12  ;;  %v126_v10 = vlaneseq  ;;  %vm133_vm7 = vcmask 8192   ;;  %p181_p8 = scmp.ne.s32.totalorder %s142_s20, %s180_s21  ;;  %p185_p9 = scmp.lt.s32.totalorder %s142_s20, %s142_s20 }
  0x19   :  { %v29_v22 = vrot.slane %v28_v16, 2  ;;  %v36_v23 = vrot.slane %v35_v17, 2  ;;  %v66_v25 = vadd.f32 %v65_v19, %v64_v14  ;;  %v73_v27 = vadd.f32 %v72_v21, %v71_v15  ;;  %p186_p10 = scmp.lt.s32.totalorder %s184_s22, %s180_s21 }
  0x1a   :  { %v48_v24 = vrot.slane %v47_v18, 2  ;;  %v55_v26 = vrot.slane %v54_v20, 2 }
  0x1b   :  { %v30_v28 = vadd.f32 %v29_v22, %v28_v16  ;;  %v37_v29 = vadd.f32 %v36_v23, %v35_v17  ;;  %v67_v31 = vrot.slane %v66_v25, 2  ;;  %v74_v33 = vrot.slane %v73_v27, 2  ;;  %p187_p11 = por %p186_p10, %p185_p9 }
  0x1c   :  { %v49_v30 = vadd.f32 %v48_v24, %v47_v18  ;;  %v56_v32 = vadd.f32 %v55_v26, %v54_v20  ;;  %v127_v16 = vand.u32 127, %v126_v10  ;;  %v129_v18 = vshrl.u32 %v126_v10, 7 }
  0x1d   :  { %v31_v34 = vrot.slane %v30_v28, 1  ;;  %v38_v35 = vrot.slane %v37_v29, 1  ;;  %v68_v37 = vadd.f32 %v67_v31, %v66_v25  ;;  %v75_v39 = vadd.f32 %v74_v33, %v73_v27  ;;  %p188_p12 = pnand %p187_p11, %p181_p8 }
  0x1e   :  { %v50_v36 = vrot.slane %v49_v30, 1  ;;  %v57_v38 = vrot.slane %v56_v32, 1  ;;  %v130_v23 = vsub.s32 %v127_v16, %v129_v18 }
  0x1f   :  { %v32_v40 = vadd.f32 %v31_v34, %v30_v28  ;;  %v39_v41 = vadd.f32 %v38_v35, %v37_v29  ;;  %v69_v43 = vrot.slane %v68_v37, 1  ;;  %v76_v45 = vrot.slane %v75_v39, 1 }
  0x20   :  { %v51_v42 = vadd.f32 %v50_v36, %v49_v30  ;;  %v58_v44 = vadd.f32 %v57_v38, %v56_v32 }
  0x21   :  { %v40_v46 = vmul.f32 0.125, %v32_v40  ;;  %v41_v47 = vmul.f32 0.125, %v39_v41  ;;  %v70_v49 = vadd.f32 %v69_v43, %v68_v37  ;;  %v77_v51 = vadd.f32 %v76_v45, %v75_v39 }
  0x22   :  { %v59_v48 = vmul.f32 0.125, %v51_v42  ;;  %v60_v50 = vmul.f32 0.125, %v58_v44 }
  0x23   :  { %v78_v53 = vmul.f32 0.125, %v70_v49  ;;  %v79_v55 = vmul.f32 0.125, %v77_v51 }
  0x24   :  { %v80_v52 = vsub.f32 %v40_v46, %v59_v48  ;;  %v81_v54 = vsub.f32 %v41_v47, %v60_v50 }
  0x25   :  { %v84_v57 = vsub.f32 %v40_v46, %v78_v53  ;;  %v85_v59 = vsub.f32 %v41_v47, %v79_v55 }
  0x26   :  { %v82_v56 = vadd.f32 1e-06, %v80_v52  ;;  %v83_v58 = vadd.f32 1e-06, %v81_v54 }
  0x27   :  { %v86_v61 = vadd.f32 1e-06, %v84_v57  ;;  %v87_v63 = vadd.f32 1e-06, %v85_v59 }
  0x28   :  { %v88_v60 = vmul.f32 %v82_v56, %v82_v56  ;;  %v89_v62 = vmul.f32 %v83_v58, %v83_v58 }
  0x29   :  { %v106_v0 = vmul.f32 %v86_v61, %v86_v61  ;;  %v107_v2 = vmul.f32 %v87_v63, %v87_v63 }
  0x2a   :  { %v93_v1 = vsel %vm92_vm1, %v89_v62, %v88_v60 }
  0x2b   :  { %v96_v3 = vsel %vm95_vm2, %v93_v1, 0.0  ;;  %v110_v4 = vsel %vm92_vm1, %v107_v2, %v106_v0 }
  0x2c   :  { %97 = vadd.xlane.f32.xlu0 %v96_v3  ;;  %v112_v5 = vsel %vm95_vm2, %v110_v4, 0.0 }
  0x30   :  { %113 = vadd.xlane.f32.xlu0 %v112_v5 }
  0xb9   :  { %v98_v6 = vpop.xlane.xlu0 %97 }
  0xba   :  { %154 = vrsqrt.f32 %v98_v6  ;;  %vm101_vm3 = vcmp.eq.f32.partialorder %v98_v6, inf  ;;  %v104_v14 = vand.u32 2147483648, %v98_v6  ;;  %vm103_vm5 = vcmp.eq.f32.partialorder %v98_v6, 0.0 }
  0xbd   :  { %v114_v7 = vpop.xlane.xlu0 %113 }
  0xbe   :  { %156 = vrsqrt.f32 %v114_v7  ;;  %vm117_vm4 = vcmp.eq.f32.partialorder %v114_v7, inf  ;;  %v120_v15 = vand.u32 2147483648, %v114_v7  ;;  %vm119_vm6 = vcmp.eq.f32.partialorder %v114_v7, 0.0 }
  0xc4   :  { %v155_v8 = vpop.eup %154 }
  0xc5   :  { %v100_v9 = vmul.f32 %v155_v8, %v98_v6 }
  0xc7   :  { %v102_v12 = vsel %vm101_vm3, %v98_v6, %v100_v9 }
  0xc8   :  { %v157_v11 = vpop.eup %156  ;;  %v105_v19 = vsel %vm103_vm5, %v104_v14, %v102_v12 }
  0xc9   :  { %v116_v13 = vmul.f32 %v157_v11, %v114_v7 }
  0xcb   :  { %v118_v17 = vsel %vm117_vm4, %v114_v7, %v116_v13 }
  0xcc   :  { %v121_v20 = vsel %vm119_vm6, %v120_v15, %v118_v17 }
  0xcd   :  { %v122_v21 = vsub.f32 %v105_v19, %v121_v20 }
  0xcf   :  { %v123_v22 = vadd.f32 1.0, %v122_v21 }
  0xd1   :  { %v124_v24 = vmax.f32 %v123_v22, 0.0 }
  0xd3   :  { %v131_v25 = vrot.slane %v124_v24, %v130_v23 }
  0xd5   :  { %134 = vst.msk [vmem:[#allocation5] sm:$0x1] %vm133_vm7, %v131_v25 }
  0xd6   :  { %191 = shalt.err (!%p188_p12)
}
  0xd7   :  { %s192_s25 = scalar_lea.hbm %s251_s1, 16 }
  0xd8   :  { %p193_p13 = scmp.ne.s32.totalorder %s251_s1, %s192_s25  ;;  %p196_p0 = scmp.lt.u32.totalorder %s192_s25, %s251_s1 }
  0xda   :  { %p198_p1 = pnand %p196_p0, %p193_p13 }
  0xdc   :  { %201 = shalt.err (!%p198_p1)
}
  0xdd   :  { %144 = dma.vmem_to_hbm [thread:$0]  %s142_s20, 16, %s251_s1, [#allocation4]  }
  0xde   :  { %204 = dma.done.wait [#allocation4], 16  }
  0xdf   :  { %205 = vsyncadd [#allocation4], 4294967280 }
  0xe0   :  { %148 = vsyncpa [#allocation3], 1 }
  0xe1   :  { %149 = vsyncpa [#allocation4], 1 }

</bundles_post_ra>
